<compile_context>
chip_gen: v7x
topology: tpu7x:2x2x1
jax: 0.10.0
libtpu: 0.0.40
codegen_flags: <defaults>
</compile_context>

<pallas_src>
import functools

import jax
import jax.numpy as jnp
import numpy as np
from jax.experimental import pallas as pl
from jax.experimental.pallas import tpu as pltpu

LANE = 128
SUBLANE = 8


def _focal_loss_kernel(x_ref, y_ref, out_ref, *,
                       alpha, gamma, rows, tm, bps, n_blocks):
    c = pl.program_id(0)   # split index ("parallel": one per TC on v7x)
    j = pl.program_id(1)   # block index within the split ("arbitrary")

    # Output block index is (c, 0, 0): constant across j, so out_ref stays
    # VMEM-resident for the whole reduction and acts as the accumulator.
    @pl.when(j == 0)
    def _():
        out_ref[...] = jnp.zeros_like(out_ref)

    x = x_ref[...].astype(jnp.float32)
    y = y_ref[...].astype(jnp.float32)

    # Numerically stable log(sigmoid(x)) via softplus; log(1 - sigmoid(x)) is
    # recovered as log_probs - x (no second select needed).
    sp = jnp.log1p(jnp.exp(-jnp.abs(x)))        # EUP: exp + log1p
    log_probs = jnp.minimum(x, 0.0) - sp        # log(sigmoid(x))
    probs = jnp.exp(log_probs)                  # EUP: exp  (= sigmoid(x))

    d = jnp.abs(y - probs)
    if gamma == 2.0:
        dg = d * d                              # default path: no pow
    elif float(gamma).is_integer() and 1.0 <= gamma <= 4.0:
        dg = d
        for _ in range(int(gamma) - 1):
            dg = dg * d
    else:
        dg = jnp.power(d, gamma)

    # ce = alpha*y*log_p + (1-alpha)*(1-y)*(log_p - x) = w*log_p - u*x
    w = (1.0 - alpha) + (2.0 * alpha - 1.0) * y
    u = (1.0 - alpha) * (1.0 - y)
    ce = w * log_probs - u * x

    # coeff = -dg; the sign is applied once to the final scalar in the wrapper.
    contrib = ce * dg

    gblk = c * bps + j   # unclamped global block index (int32; fine for any
                         # realistic tensor size)

    # Interior blocks: fully valid, accumulate without any masking work.
    @pl.when(gblk < n_blocks - 1)
    def _():
        out_ref[0] = out_ref[0] + contrib.reshape(
            tm // SUBLANE, SUBLANE, LANE).sum(axis=0)

    # Last (possibly partial) block and clamped out-of-range repeat blocks:
    # mask by local row index against the remaining valid-row count (<= 0 for
    # fully out-of-range blocks -> everything masked to zero).
    @pl.when(gblk >= n_blocks - 1)
    def _():
        valid = rows - gblk * tm
        row_idx = jax.lax.broadcasted_iota(jnp.int32, (tm, 1), 0)
        masked = jnp.where(row_idx < valid, contrib, 0.0)
        out_ref[0] = out_ref[0] + masked.reshape(
            tm // SUBLANE, SUBLANE, LANE).sum(axis=0)


def _default_n_splits():
    # v7x has 2 TensorCores per chip; v5e/v6e have 1 (a split there is purely
    # sequential overhead).
    try:
        kind = jax.devices()[0].device_kind.lower()
    except Exception:
        return 1
    return 2 if ("v7" in kind or "tpu7" in kind) else 1


def focal_loss(logits, label, *, alpha=0.25, gamma=2.0, reduction="mean",
               tm_max=4096, n_splits=None):
    assert logits.shape == label.shape
    total = int(np.prod(logits.shape))

    x = logits.reshape(-1)
    y = label.reshape(-1)

    # Pad (only when required) to a multiple of one (8,128) vreg.  The sentinel
    # pair (logit=-100, label=0) produces exactly 0 loss for the supported
    # gamma range, so no extra masking is needed for these rows.
    chunk = SUBLANE * LANE
    padded = ((total + chunk - 1) // chunk) * chunk
    if padded != total:
        pad = padded - total
        x = jnp.pad(x, (0, pad), constant_values=-100.0)
        y = jnp.pad(y, (0, pad), constant_values=0)

    rows = padded // LANE            # multiple of 8
    x = x.reshape(rows, LANE)
    y = y.reshape(rows, LANE)

    tm = min(tm_max, rows)           # either == rows (full dim) or mult. of 32
    n_blocks = -(-rows // tm)

    if n_splits is None:
        n_splits = _default_n_splits()
    n_splits = max(1, min(n_splits, n_blocks))
    bps = -(-n_blocks // n_splits)   # blocks per split

    kernel = functools.partial(
        _focal_loss_kernel,
        alpha=float(alpha), gamma=float(gamma),
        rows=rows, tm=tm, bps=bps, n_blocks=n_blocks)

    def in_map(c, j):
        # Clamp so out-of-range grid points re-read the last real block (their
        # contribution is masked to zero inside the kernel).
        return (jnp.minimum(c * bps + j, n_blocks - 1), 0)

    # Double-buffered input blocks; raise the scoped-VMEM limit only if a
    # larger-than-default tm_max pushes past v5e's 16 MiB scoped default.
    blk_in_bytes = tm * LANE * (x.dtype.itemsize + y.dtype.itemsize)
    vmem_est = 2 * blk_in_bytes + (1 << 20)
    cp_kwargs = dict(dimension_semantics=("parallel", "arbitrary"))
    if vmem_est > (16 << 20):
        cp_kwargs["vmem_limit_bytes"] = int(min(vmem_est + (4 << 20), 48 << 20))

    partials = pl.pallas_call(
        kernel,
        out_shape=jax.ShapeDtypeStruct((n_splits, SUBLANE, LANE), jnp.float32),
        grid_spec=pltpu.PrefetchScalarGridSpec(
            num_scalar_prefetch=0,
            grid=(n_splits, bps),
            in_specs=[pl.BlockSpec((tm, LANE), in_map),
                      pl.BlockSpec((tm, LANE), in_map)],
            out_specs=pl.BlockSpec((1, SUBLANE, LANE), lambda c, j: (c, 0, 0)),
        ),
        compiler_params=pltpu.CompilerParams(**cp_kwargs),
    )(x, y)

    # One cheap cross-lane/sublane reduce on the tiny partial-sum output; the
    # kernel accumulates +ce*d^gamma, so apply the (-coeff) sign here.
    loss_sum = -jnp.sum(partials)

    if reduction == "mean":
        return loss_sum / total
    if reduction == "sum":
        return loss_sum
    # TODO(synk): reduction='none' (per-element loss output) not wired up; the
    # default module configuration uses 'mean'.
    raise NotImplementedError("reduction must be 'mean' or 'sum'")


def _focal_loss_ref(logits, label, alpha=0.25, gamma=2.0):
    # Faithful JAX translation of the PyTorch forward (sigmoid + softplus).
    x = logits.astype(jnp.float32)
    y = label.astype(jnp.float32)
    probs = jax.nn.sigmoid(x)
    coeff = -jnp.abs(y - probs) ** gamma
    sp = jnp.log1p(jnp.exp(-jnp.abs(x)))
    log_probs = jnp.where(x >= 0, -sp, x - sp)
    log_1_probs = jnp.where(x >= 0, -x - sp, -sp)
    ce = alpha * y * log_probs + (1.0 - alpha) * (1.0 - y) * log_1_probs
    return jnp.mean(ce * coeff)


if __name__ == "__main__":
    key = jax.random.PRNGKey(0)
    k1, k2 = jax.random.split(key)
    # NCHW logits / binary float labels, like the PyTorch usage example.
    logits = jax.random.normal(k1, (2, 4, 16, 16), dtype=jnp.float32)
    label = jax.random.bernoulli(k2, 0.5, (2, 4, 16, 16)).astype(jnp.float32)

    out = focal_loss(logits, label, alpha=0.25, gamma=2.0, reduction="mean")
    out = jax.block_until_ready(out)

    ref = _focal_loss_ref(logits, label)
    np.testing.assert_allclose(np.asarray(out), np.asarray(ref),
                               rtol=1e-4, atol=1e-6)
    print("KERNEL_OK")
</pallas_src>

<mosaic_0001>
module attributes {stable_mosaic.version = 11 : i64} {
  func.func @_focal_loss_kernel(%arg0: i32, %arg1: i32, %arg2: memref<16x128xf32, #tpu.memory_space<vmem>>, %arg3: memref<16x128xf32, #tpu.memory_space<vmem>>, %arg4: memref<1x8x128xf32, #tpu.memory_space<vmem>>) attributes {dimension_semantics = [#tpu.dimension_semantics<parallel>, #tpu.dimension_semantics<arbitrary>], iteration_bounds = array<i64: 1, 1>, scalar_prefetch = 0 : i64, scratch_operands = 0 : i64, tpu.core_type = #tpu.core_type<tc>, window_params = [{transform_indices = @transform_0, window_bounds = array<i64: 16, 128>}, {transform_indices = @transform_1, window_bounds = array<i64: 16, 128>}, {transform_indices = @transform_2, window_bounds = array<i64: 1, 8, 128>}]} {
    %c0_i32 = arith.constant 0 : i32
    %0 = arith.cmpi eq, %arg1, %c0_i32 : i32
    %1 = arith.extui %0 : i1 to i32
    %c0_i32_0 = arith.constant 0 : i32
    %2 = arith.cmpi ne, %1, %c0_i32_0 : i32
    scf.if %2 {
      %cst_13 = arith.constant 0.000000e+00 : f32
      %37 = vector.broadcast %cst_13 : f32 to vector<1x8x128xf32>
      %c0_14 = arith.constant 0 : index
      %c0_15 = arith.constant 0 : index
      %c0_16 = arith.constant 0 : index
      %38 = vector.load %arg4[%c0_14, %c0_15, %c0_16] : memref<1x8x128xf32, #tpu.memory_space<vmem>>, vector<1x8x128xf32>
      tpu.vector_store %arg4[%c0_14, %c0_15, %c0_16], %37 {strides = array<i32>} : memref<1x8x128xf32, #tpu.memory_space<vmem>>, vector<1x8x128xf32>,
    } else {
    }
    %c0 = arith.constant 0 : index
    %c0_1 = arith.constant 0 : index
    %3 = vector.load %arg2[%c0, %c0_1] : memref<16x128xf32, #tpu.memory_space<vmem>>, vector<16x128xf32>
    %c0_2 = arith.constant 0 : index
    %c0_3 = arith.constant 0 : index
    %4 = vector.load %arg3[%c0_2, %c0_3] : memref<16x128xf32, #tpu.memory_space<vmem>>, vector<16x128xf32>
    %5 = math.absf %3 : vector<16x128xf32>
    %cst = arith.constant 0.000000e+00 : f32
    %6 = vector.broadcast %cst : f32 to vector<16x128xf32>
    %7 = arith.subf %6, %5 : vector<16x128xf32>
    %8 = math.exp %7 : vector<16x128xf32>
    %9 = math.log1p %8 : vector<16x128xf32>
    %cst_4 = arith.constant 0.000000e+00 : f32
    %10 = vector.broadcast %cst_4 : f32 to vector<16x128xf32>
    %11 = arith.minimumf %3, %10 : vector<16x128xf32>
    %12 = arith.subf %11, %9 : vector<16x128xf32>
    %13 = math.exp %12 : vector<16x128xf32>
    %14 = arith.subf %4, %13 : vector<16x128xf32>
    %15 = math.absf %14 : vector<16x128xf32>
    %16 = arith.mulf %15, %15 : vector<16x128xf32>
    %cst_5 = arith.constant -5.000000e-01 : f32
    %17 = vector.broadcast %cst_5 : f32 to vector<16x128xf32>
    %18 = arith.mulf %17, %4 : vector<16x128xf32>
    %cst_6 = arith.constant 7.500000e-01 : f32
    %19 = vector.broadcast %cst_6 : f32 to vector<16x128xf32>
    %20 = arith.addf %19, %18 : vector<16x128xf32>
    %cst_7 = arith.constant 1.000000e+00 : f32
    %21 = vector.broadcast %cst_7 : f32 to vector<16x128xf32>
    %22 = arith.subf %21, %4 : vector<16x128xf32>
    %cst_8 = arith.constant 7.500000e-01 : f32
    %23 = vector.broadcast %cst_8 : f32 to vector<16x128xf32>
    %24 = arith.mulf %23, %22 : vector<16x128xf32>
    %25 = arith.mulf %20, %12 : vector<16x128xf32>
    %26 = arith.mulf %24, %3 : vector<16x128xf32>
    %27 = arith.subf %25, %26 : vector<16x128xf32>
    %28 = arith.mulf %27, %16 : vector<16x128xf32>
    %c1_i32 = arith.constant 1 : i32
    %29 = arith.muli %arg0, %c1_i32 : i32
    %30 = arith.addi %29, %arg1 : i32
    %c0_i32_9 = arith.constant 0 : i32
    %31 = arith.cmpi slt, %30, %c0_i32_9 : i32
    %32 = arith.extui %31 : i1 to i32
    %c0_i32_10 = arith.constant 0 : i32
    %33 = arith.cmpi ne, %32, %c0_i32_10 : i32
    scf.if %33 {
      %c0_13 = arith.constant 0 : index
      %c0_14 = arith.constant 0 : index
      %c0_15 = arith.constant 0 : index
      %37 = vector.load %arg4[%c0_13, %c0_14, %c0_15] : memref<1x8x128xf32, #tpu.memory_space<vmem>>, vector<1x8x128xf32>
      %38 = vector.shape_cast %37 : vector<1x8x128xf32> to vector<8x128xf32>
      %39 = vector.shape_cast %28 : vector<16x128xf32> to vector<2x8x128xf32>
      %cst_16 = arith.constant dense<0.000000e+00> : vector<8x128xf32>
      %40 = vector.multi_reduction <add>, %39, %cst_16 [0] : vector<2x8x128xf32> to vector<8x128xf32>
      %41 = arith.addf %38, %40 : vector<8x128xf32>
      %c0_17 = arith.constant 0 : index
      %c0_18 = arith.constant 0 : index
      %c0_19 = arith.constant 0 : index
      %42 = vector.load %arg4[%c0_17, %c0_18, %c0_19] : memref<1x8x128xf32, #tpu.memory_space<vmem>>, vector<1x8x128xf32>
      %43 = vector.shape_cast %42 : vector<1x8x128xf32> to vector<8x128xf32>
      %44 = vector.shape_cast %41 : vector<8x128xf32> to vector<1x8x128xf32>
      tpu.vector_store %arg4[%c0_17, %c0_18, %c0_19], %44 {strides = array<i32>} : memref<1x8x128xf32, #tpu.memory_space<vmem>>, vector<1x8x128xf32>,
    } else {
    }
    %c0_i32_11 = arith.constant 0 : i32
    %34 = arith.cmpi sge, %30, %c0_i32_11 : i32
    %35 = arith.extui %34 : i1 to i32
    %c0_i32_12 = arith.constant 0 : i32
    %36 = arith.cmpi ne, %35, %c0_i32_12 : i32
    scf.if %36 {
      %c16_i32 = arith.constant 16 : i32
      %37 = arith.muli %30, %c16_i32 : i32
      %c16_i32_13 = arith.constant 16 : i32
      %38 = arith.subi %c16_i32_13, %37 : i32
      %39 = tpu.iota {dimensions = array<i32: 0>} : vector<16x1xi32>
      %40 = vector.broadcast %38 : i32 to vector<16x1xi32>
      %41 = arith.cmpi slt, %39, %40 : vector<16x1xi32>
      %cst_14 = arith.constant 0.000000e+00 : f32
      %42 = vector.shape_cast %41 : vector<16x1xi1> to vector<16x1xi1>
      %43 = vector.broadcast %42 : vector<16x1xi1> to vector<16x128xi1>
      %44 = vector.broadcast %cst_14 : f32 to vector<16x128xf32>
      %45 = arith.select %43, %28, %44 : vector<16x128xi1>, vector<16x128xf32>
      %c0_15 = arith.constant 0 : index
      %c0_16 = arith.constant 0 : index
      %c0_17 = arith.constant 0 : index
      %46 = vector.load %arg4[%c0_15, %c0_16, %c0_17] : memref<1x8x128xf32, #tpu.memory_space<vmem>>, vector<1x8x128xf32>
      %47 = vector.shape_cast %46 : vector<1x8x128xf32> to vector<8x128xf32>
      %48 = vector.shape_cast %45 : vector<16x128xf32> to vector<2x8x128xf32>
      %cst_18 = arith.constant dense<0.000000e+00> : vector<8x128xf32>
      %49 = vector.multi_reduction <add>, %48, %cst_18 [0] : vector<2x8x128xf32> to vector<8x128xf32>
      %50 = arith.addf %47, %49 : vector<8x128xf32>
      %c0_19 = arith.constant 0 : index
      %c0_20 = arith.constant 0 : index
      %c0_21 = arith.constant 0 : index
      %51 = vector.load %arg4[%c0_19, %c0_20, %c0_21] : memref<1x8x128xf32, #tpu.memory_space<vmem>>, vector<1x8x128xf32>
      %52 = vector.shape_cast %51 : vector<1x8x128xf32> to vector<8x128xf32>
      %53 = vector.shape_cast %50 : vector<8x128xf32> to vector<1x8x128xf32>
      tpu.vector_store %arg4[%c0_19, %c0_20, %c0_21], %53 {strides = array<i32>} : memref<1x8x128xf32, #tpu.memory_space<vmem>>, vector<1x8x128xf32>,
    } else {
    }
    return
  }
  func.func @transform_0(%arg0: i32, %arg1: i32) -> (i32, i32) {
    %c1_i32 = arith.constant 1 : i32
    %0 = arith.muli %arg0, %c1_i32 : i32
    %1 = arith.addi %0, %arg1 : i32
    %c0_i32 = arith.constant 0 : i32
    %2 = arith.minsi %1, %c0_i32 : i32
    %c0_i32_0 = arith.constant 0 : i32
    %c0_i32_1 = arith.constant 0 : i32
    return %2, %c0_i32_0 : i32, i32
  }
  func.func @transform_1(%arg0: i32, %arg1: i32) -> (i32, i32) {
    %c1_i32 = arith.constant 1 : i32
    %0 = arith.muli %arg0, %c1_i32 : i32
    %1 = arith.addi %0, %arg1 : i32
    %c0_i32 = arith.constant 0 : i32
    %2 = arith.minsi %1, %c0_i32 : i32
    %c0_i32_0 = arith.constant 0 : i32
    %c0_i32_1 = arith.constant 0 : i32
    return %2, %c0_i32_0 : i32, i32
  }
  func.func @transform_2(%arg0: i32, %arg1: i32) -> (i32, i32, i32) {
    %c0_i32 = arith.constant 0 : i32
    %c0_i32_0 = arith.constant 0 : i32
    %c0_i32_1 = arith.constant 0 : i32
    return %arg0, %c0_i32, %c0_i32_0 : i32, i32, i32
  }
}

</mosaic_0001>

<bundles_post_ra>
// kernel: tpu_custom_call.1
= control target key start
LH: loop header
LB: loop body
LE: loop exit
PB: predicated region body
PF: predicated region fallthrough
CT: control target
= control target key end

     0   :  { %7 = vsyncpa [#allocation3], 0  ;;  %s322_s0 = inlined_call_operand.hbm [shape: f32[16,128], index: 0, kind: input, shape index: {}]   ;;  %s323_s1 = inlined_call_operand.hbm [shape: f32[16,128], index: 1, kind: input, shape index: {}]   ;;  %s324_s2 = inlined_call_operand.hbm [shape: f32[1,8,128], index: 2, kind: output, shape index: {}]  }
   0x1   :  { %8 = vsyncpa [#allocation6], 0 }
   0x2   :  { %9 = vsyncpa [#allocation4], 0  ;;  %s266_s9 = smov [#allocation2]   ;;  %s194_s13 = scalar_lea.hbm %s322_s0, 256 }
   0x3   :  { %s21_s10 = sshll.u32 %s266_s9, 4  ;;  %p195_p0 = scmp.ne.s32.totalorder %s322_s0, %s194_s13  ;;  %s22_s10 = int_to_ptr.vmem [resolvable:$true] %s21_s10 }
   0x4   :  { %p198_p1 = scmp.lt.u32.totalorder %s194_s13, %s322_s0 }
   0x6   :  { %p200_p2 = pnand %p198_p1, %p195_p0 }
   0x8   :  { %203 = shalt.err (!%p200_p2)
}
   0x9   :  { %s204_s18 = scalar_lea.vmem %s22_s10, 256  ;;  %p209_p4 = scmp.lt.s32.totalorder %s22_s10, %s22_s10 }
   0xa   :  { %p205_p3 = scmp.ne.s32.totalorder %s22_s10, %s204_s18  ;;  %p210_p5 = scmp.lt.s32.totalorder %s204_s18, %s204_s18 }
   0xc   :  { %p211_p6 = por %p210_p5, %p209_p4 }
   0xe   :  { %p212_p7 = pnand %p211_p6, %p205_p3 }
  0x10   :  { %215 = shalt.err (!%p212_p7)
}
  0x11   :  { %s267_s19 = smov 128   ;;  %s268_s20 = smov 8  }
  0x12   :  { %27 = dma.hbm_to_vmem [thread:$0]  %s322_s0, 256, %s22_s10, [#allocation3], %s267_s19, %s267_s19, %s268_s20  }
  0x13   :  { %s269_s23 = smov [#allocation5]   ;;  %s216_s27 = scalar_lea.hbm %s323_s1, 256 }
  0x14   :  { %s39_s24 = sshll.u32 %s269_s23, 4  ;;  %p217_p8 = scmp.ne.s32.totalorder %s323_s1, %s216_s27  ;;  %s40_s24 = int_to_ptr.vmem [resolvable:$true] %s39_s24 }
  0x15   :  { %p220_p9 = scmp.lt.u32.totalorder %s216_s27, %s323_s1 }
  0x17   :  { %p222_p10 = pnand %p220_p9, %p217_p8 }
  0x19   :  { %225 = shalt.err (!%p222_p10)
}
  0x1a   :  { %s226_s4 = scalar_lea.vmem %s40_s24, 256  ;;  %p231_p12 = scmp.lt.s32.totalorder %s40_s24, %s40_s24 }
  0x1b   :  { %p227_p11 = scmp.ne.s32.totalorder %s40_s24, %s226_s4  ;;  %p232_p13 = scmp.lt.s32.totalorder %s226_s4, %s226_s4 }
  0x1d   :  { %p233_p0 = por %p232_p13, %p231_p12 }
  0x1f   :  { %p234_p1 = pnand %p233_p0, %p227_p11 }
  0x21   :  { %237 = shalt.err (!%p234_p1)
}
  0x22   :  { %45 = dma.hbm_to_vmem [thread:$0]  %s323_s1, 256, %s40_s24, [#allocation6], %s267_s19, %s267_s19, %s268_s20  }
  0x23   :  { %260 = dma.done.wait [#allocation3], 256  }
  0x24   :  { %261 = vsyncadd [#allocation3], 4294967040 }
  0x25   :  { %262 = dma.done.wait [#allocation6], 256  }
  0x26   :  { %263 = vsyncadd [#allocation6], 4294967040  ;;  %v65_v0 = vld [vmem:[#allocation2] sm:$0xff]  ;;  %v66_v1 = vld [vmem:[#allocation2 + $0x8] sm:$0xff]  ;;  %s270_s1 = smov [#allocation7]  }
  0x27   :  { %v69_v2 = vand.u32 2147483647, %v65_v0  ;;  %v70_v3 = vand.u32 2147483647, %v66_v1  ;;  %v95_v21 = vmin.f32 %v65_v0, 0.0  ;;  %v96_v24 = vmin.f32 %v66_v1, 0.0 }
  0x28   :  { %v67_v30 = vld [vmem:[#allocation5] sm:$0xff]  ;;  %v68_v32 = vld [vmem:[#allocation5 + $0x8] sm:$0xff]  ;;  %s162_s6 = sshll.u32 %s270_s1, 4  ;;  %s163_s6 = int_to_ptr.vmem [resolvable:$true] %s162_s6 }
  0x29   :  { %v71_v4 = vsub.f32 0.0, %v69_v2  ;;  %v72_v5 = vsub.f32 0.0, %v70_v3  ;;  %v109_v34 = vmul.f32 -0.5, %v67_v30  ;;  %v113_v35 = vsub.f32 1.0, %v67_v30  ;;  %s238_s7 = scalar_lea.vmem %s163_s6, 128  ;;  %p243_p3 = scmp.lt.s32.totalorder %s163_s6, %s163_s6 }
  0x2a   :  { %v110_v36 = vmul.f32 -0.5, %v68_v32  ;;  %v114_v37 = vsub.f32 1.0, %v68_v32  ;;  %p239_p2 = scmp.ne.s32.totalorder %s163_s6, %s238_s7  ;;  %p244_p4 = scmp.lt.s32.totalorder %s238_s7, %s238_s7 }
  0x2b   :  { %v73_v6 = vmul.f32 1.442695, %v71_v4  ;;  %v75_v7 = vmul.f32 1.442695, %v72_v5  ;;  %v111_v38 = vadd.f32 0.75, %v109_v34  ;;  %v115_v39 = vmul.f32 0.75, %v113_v35 }
  0x2c   :  { %v112_v40 = vadd.f32 0.75, %v110_v36  ;;  %v116_v41 = vmul.f32 0.75, %v114_v37  ;;  %p245_p5 = por %p244_p4, %p243_p3 }
  0x2d   :  { %182 = vpow2.f32 %v73_v6  ;;  %v119_v43 = vmul.f32 %v115_v39, %v65_v0 }
  0x2e   :  { %184 = vpow2.f32 %v75_v7  ;;  %v120_v46 = vmul.f32 %v116_v41, %v66_v1  ;;  %p246_p6 = pnand %p245_p5, %p239_p2 }
  0x37   :  { %v183_v8 = vpop.eup %182 }
  0x38   :  { %v185_v9 = vpop.eup %184  ;;  %v77_v10 = vadd.f32 1.0, %v183_v8  ;;  %v80_v12 = vmul.f32 -0.5, %v183_v8  ;;  %v83_v15 = vand.u32 2147483647, %v183_v8 }
  0x39   :  { %v86_v11 = vadd.f32 1.0, %v185_v9  ;;  %v89_v13 = vmul.f32 -0.5, %v185_v9  ;;  %v92_v17 = vand.u32 2147483647, %v185_v9 }
  0x3a   :  { %186 = vlog2.f32 %v77_v10  ;;  %v81_v14 = vadd.f32 1.0, %v80_v12  ;;  %vm84_vm0 = vcmp.lt.f32.partialorder %v83_v15, 0.0004427343 }
  0x3b   :  { %188 = vlog2.f32 %v86_v11  ;;  %v90_v16 = vadd.f32 1.0, %v89_v13  ;;  %vm93_vm1 = vcmp.lt.f32.partialorder %v92_v17, 0.0004427343 }
  0x3c   :  { %v82_v18 = vmul.f32 %v183_v8, %v81_v14 }
  0x3d   :  { %v91_v20 = vmul.f32 %v185_v9, %v90_v16 }
  0x44   :  { %v187_v19 = vpop.eup %186 }
  0x45   :  { %v189_v22 = vpop.eup %188  ;;  %v79_v23 = vmul.f32 0.6931472, %v187_v19 }
  0x46   :  { %v88_v25 = vmul.f32 0.6931472, %v189_v22 }
  0x47   :  { %v85_v26 = vsel %vm84_vm0, %v82_v18, %v79_v23 }
  0x48   :  { %v94_v27 = vsel %vm93_vm1, %v91_v20, %v88_v25  ;;  %v97_v28 = vsub.f32 %v95_v21, %v85_v26 }
  0x49   :  { %v98_v29 = vsub.f32 %v96_v24, %v94_v27 }
  0x4a   :  { %v99_v31 = vmul.f32 1.442695, %v97_v28  ;;  %v117_v42 = vmul.f32 %v111_v38, %v97_v28 }
  0x4b   :  { %v101_v33 = vmul.f32 1.442695, %v98_v29  ;;  %v118_v45 = vmul.f32 %v112_v40, %v98_v29 }
  0x4c   :  { %190 = vpow2.f32 %v99_v31  ;;  %v121_v51 = vsub.f32 %v117_v42, %v119_v43 }
  0x4d   :  { %192 = vpow2.f32 %v101_v33  ;;  %v122_v53 = vsub.f32 %v118_v45, %v120_v46 }
  0x56   :  { %v191_v44 = vpop.eup %190 }
  0x57   :  { %v193_v47 = vpop.eup %192  ;;  %v103_v48 = vsub.f32 %v67_v30, %v191_v44 }
  0x58   :  { %v104_v49 = vsub.f32 %v68_v32, %v193_v47 }
  0x59   :  { %v105_v50 = vand.u32 2147483647, %v103_v48 }
  0x5a   :  { %v106_v52 = vand.u32 2147483647, %v104_v49 }
  0x5b   :  { %v107_v54 = vmul.f32 %v105_v50, %v105_v50 }
  0x5c   :  { %v108_v55 = vmul.f32 %v106_v52, %v106_v52 }
  0x5d   :  { %v123_v56 = vmul.f32 %v121_v51, %v107_v54 }
  0x5e   :  { %v124_v57 = vmul.f32 %v122_v53, %v108_v55 }
  0x60   :  { %v153_v58 = vadd.f32 %v124_v57, %v123_v56 }
  0x62   :  { %155 = vst [vmem:[#allocation7] sm:$0xff] %v153_v58 }
  0x63   :  { %249 = shalt.err (!%p246_p6)
}
  0x64   :  { %s250_s10 = scalar_lea.hbm %s324_s2, 128 }
  0x65   :  { %p251_p7 = scmp.ne.s32.totalorder %s324_s2, %s250_s10  ;;  %p254_p8 = scmp.lt.u32.totalorder %s250_s10, %s324_s2 }
  0x67   :  { %p256_p9 = pnand %p254_p8, %p251_p7 }
  0x69   :  { %259 = shalt.err (!%p256_p9)
}
  0x6a   :  { %165 = dma.vmem_to_hbm [thread:$0]  %s163_s6, 128, %s324_s2, [#allocation4]  }
  0x6b   :  { %264 = dma.done.wait [#allocation4], 128  }
  0x6c   :  { %265 = vsyncadd [#allocation4], 4294967168 }
  0x6d   :  { %169 = vsyncpa [#allocation3], 1 }
  0x6e   :  { %170 = vsyncpa [#allocation6], 1 }
  0x6f   :  { %171 = vsyncpa [#allocation4], 1 }

</bundles_post_ra>
